<compile_context>
chip_gen: v5e
topology: v5e:2x2
jax: 0.10.0
libtpu: 0.0.40
codegen_flags: <defaults>
</compile_context>

<pallas_src>
import functools

import jax
import jax.numpy as jnp
from jax.experimental import pallas as pl
from jax.experimental.pallas import tpu as pltpu

_MiB = 1 << 20


def _rmsnorm_kernel(x_ref, w_ref, o_ref, *, eps, fuse_epilogue):
    # x_ref: (TR, D) tile of rows, w_ref: (1, D) weight, o_ref: (TR, D)
    x = x_ref[...]
    x_f32 = x.astype(jnp.float32)
    # mean of squares over the feature axis (VPU mul + XLU row-reduce)
    ms = jnp.mean(x_f32 * x_f32, axis=-1, keepdims=True)
    inv = jax.lax.rsqrt(ms + eps)                    # EUP slot, effectively free
    if fuse_epilogue:
        # Single-pass f32 epilogue, one final downcast.  Identical to the
        # exact path when x is f32; for bf16 x it skips one bf16 rounding.
        w_f32 = w_ref[...].astype(jnp.float32)
        o_ref[...] = (w_f32 * (x_f32 * inv)).astype(o_ref.dtype)
    else:
        # Exact PyTorch semantics: round to x.dtype, then w * normed
        # (multiply happens in promote(w, x), matching torch promotion).
        normed = (x_f32 * inv).astype(x.dtype)
        o_ref[...] = (w_ref[...] * normed).astype(o_ref.dtype)


def _sublane_packing(dtype):
    # sublane packing factor: 8 rows for 32-bit, 16 for 16-bit, 32 for 8-bit
    itemsize = jnp.dtype(dtype).itemsize
    return 8 * max(1, 4 // itemsize)


def _choose_row_tile_and_vmem(rows, dim, x_dtype, out_dtype):
    """Pick a row tile near the HBM roofline and the matching VMEM budget."""
    x_item = jnp.dtype(x_dtype).itemsize
    out_item = jnp.dtype(out_dtype).itemsize
    packing = _sublane_packing(x_dtype)

    # Per-row VMEM footprint: double-buffered input + double-buffered output
    # + ~2 rows of f32 intermediates (x_f32, x_f32*inv) kept live in the body.
    bytes_per_row = dim * (2 * x_item + 2 * out_item + 2 * 4)

    # 1) Roofline target: ~8 MiB of input per grid step, so the ~0.35 us fixed
    #    per-step cost is <2% even at v7x's 3.2 TB/s.
    tile = (8 * _MiB) // max(1, dim * x_item)

    # 2) VMEM cap from the real working set: keep the whole pipelined
    #    footprint ~<= 40 MiB (headroom inside v7x's 64 MiB physical VMEM).
    tile = min(tile, (40 * _MiB) // max(1, bytes_per_row))

    # 3) Never exceed the (packing-padded) row count.
    rows_padded = -(-rows // packing) * packing
    tile = min(tile, rows_padded)

    # 4) Round down to the sublane packing so stores stay unmasked.
    tile = (tile // packing) * packing

    # 5) Megacore balance: when rows allow, keep >= 4 roughly-equal grid steps
    #    so the "parallel" row axis splits evenly across v7x's 2 TensorCores.
    if rows >= 4 * packing:
        quarter = -(-rows // 4)                               # cdiv(rows, 4)
        quarter = -(-quarter // packing) * packing
        tile = min(tile, quarter) if tile > 0 else quarter

    tile = max(packing, tile)

    # Computed VMEM limit (+20% margin) instead of a blanket value.  For
    # pathological very-wide D the packing floor can push this high; raise the
    # limit (v5e/v6e have 128 MiB) rather than silently OOM at the default.
    # TODO(synk): add a D-chunked two-pass reduction for D so wide that even
    # `packing` rows exceed physical VMEM on v7x (64 MiB).
    w_bytes = -(-dim // 128) * 128 * 8 * out_item   # padded resident weight tile
    budget = int(1.2 * (tile * bytes_per_row + w_bytes))
    vmem_limit = min(max(budget, 32 * _MiB), 112 * _MiB)
    return tile, vmem_limit


def rmsnorm(x, w, eps=1e-6, *, row_tile=None, fuse_epilogue=None):
    """RMSNorm over the last axis of x, scaled by w (shape (dim,)).

    fuse_epilogue=None (default) -> fuse only when it is bit-exact (f32 x);
    pass True to also fuse for low-precision x (one fewer rounding step than
    the PyTorch reference, cheaper on v5e/v7x VPUs).
    """
    orig_shape = x.shape
    dim = orig_shape[-1]
    rows = 1
    for s in orig_shape[:-1]:
        rows *= s

    x2 = x.reshape(rows, dim)
    w2 = w.reshape(1, dim)

    # Output dtype follows promotion of w and x (matches PyTorch w * normed).
    # Perf note: pass w in x.dtype to keep the output stream narrow.
    out_dtype = jnp.promote_types(w.dtype, x.dtype)

    if fuse_epilogue is None:
        fuse_epilogue = (x.dtype == jnp.float32)   # fusion is exact for f32 x

    tile, vmem_limit = _choose_row_tile_and_vmem(rows, dim, x.dtype, out_dtype)
    if row_tile is not None:
        tile = row_tile

    # No wrapper-side padding: Pallas masks the partial last block (safe:
    # per-row reduction, OOB rows never contaminate valid rows, OOB writes
    # are masked).
    grid = (pl.cdiv(rows, tile),)

    out = pl.pallas_call(
        functools.partial(_rmsnorm_kernel, eps=eps, fuse_epilogue=fuse_epilogue),
        out_shape=jax.ShapeDtypeStruct((rows, dim), out_dtype),
        grid_spec=pltpu.PrefetchScalarGridSpec(
            num_scalar_prefetch=0,
            grid=grid,
            in_specs=[
                # NOTE: if an xprof trace ever shows exposed DMA at step
                # boundaries on v7x, add pipeline_mode=pl.Buffered(3) here and
                # re-check the VMEM budget (one extra input tile).
                pl.BlockSpec((tile, dim), lambda i: (i, 0)),
                pl.BlockSpec((1, dim), lambda i: (0, 0)),   # weight stays resident
            ],
            out_specs=pl.BlockSpec((tile, dim), lambda i: (i, 0)),
        ),
        compiler_params=pltpu.CompilerParams(
            dimension_semantics=("parallel",),
            vmem_limit_bytes=vmem_limit,
        ),
    )(x2, w2)

    return out.reshape(orig_shape)


def _ref_rmsnorm(x, w, eps=1e-6):
    x_f32 = x.astype(jnp.float32)
    normed = (x_f32 * jax.lax.rsqrt(
        jnp.mean(x_f32 * x_f32, axis=-1, keepdims=True) + eps)).astype(x.dtype)
    return w * normed


if __name__ == "__main__":
    key = jax.random.PRNGKey(0)
    k1, k2, k3 = jax.random.split(key, 3)

    batch, seq, hidden = 2, 8, 32
    # Note: hidden=32 is lane-sparse (D % 128 != 0); correct but the kernel is
    # tuned for production dims with D a multiple of 128.

    # Case 1: f32, rows divide the tile evenly (fused f32 epilogue, bit-exact).
    x = jax.random.normal(k1, (batch, seq, hidden), dtype=jnp.float32)
    w = jnp.ones((hidden,), dtype=jnp.float32)     # RMSNorm weight init = ones(dim)
    out = rmsnorm(x, w, eps=1e-6)
    jax.block_until_ready(out)
    ref = _ref_rmsnorm(x, w, eps=1e-6)
    assert out.shape == ref.shape and out.dtype == ref.dtype
    assert jnp.allclose(out, ref, atol=1e-5, rtol=1e-5)

    # Case 2: rows NOT a multiple of the tile -> exercises the masked partial
    # last block (no wrapper-side padding).
    x2 = jax.random.normal(k2, (3, 5, hidden), dtype=jnp.float32)
    out2 = rmsnorm(x2, w, eps=1e-6)
    jax.block_until_ready(out2)
    ref2 = _ref_rmsnorm(x2, w, eps=1e-6)
    assert out2.shape == ref2.shape and out2.dtype == ref2.dtype
    assert jnp.allclose(out2, ref2, atol=1e-5, rtol=1e-5)

    # Case 3: bf16 activations + bf16 weight -> exact PyTorch epilogue path
    # (intermediate .type_as(x) rounding kept), bf16 output stream.
    xb = jax.random.normal(k3, (batch, seq, hidden), dtype=jnp.float32).astype(jnp.bfloat16)
    wb = jnp.ones((hidden,), dtype=jnp.bfloat16)
    out3 = rmsnorm(xb, wb, eps=1e-6)
    jax.block_until_ready(out3)
    ref3 = _ref_rmsnorm(xb, wb, eps=1e-6)
    assert out3.shape == ref3.shape and out3.dtype == ref3.dtype
    assert jnp.allclose(out3.astype(jnp.float32), ref3.astype(jnp.float32),
                        atol=2e-2, rtol=2e-2)

    print("KERNEL_OK")
</pallas_src>

<mosaic_0001>
module attributes {stable_mosaic.version = 11 : i64} {
  func.func @_rmsnorm_kernel(%arg0: i32, %arg1: memref<16x32xf32, #tpu.memory_space<vmem>>, %arg2: memref<1x32xf32, #tpu.memory_space<vmem>>, %arg3: memref<16x32xf32, #tpu.memory_space<vmem>>) attributes {dimension_semantics = [#tpu.dimension_semantics<parallel>], iteration_bounds = array<i64: 1>, scalar_prefetch = 0 : i64, scratch_operands = 0 : i64, tpu.core_type = #tpu.core_type<tc>, window_params = [{transform_indices = @transform_0, window_bounds = array<i64: 16, 32>}, {pipeline_mode = #tpu.pipeline_mode<synchronous>, transform_indices = @transform_1, window_bounds = array<i64: 1, 32>}, {transform_indices = @transform_2, window_bounds = array<i64: 16, 32>}]} {
    %c0 = arith.constant 0 : index
    %c0_0 = arith.constant 0 : index
    %0 = vector.load %arg1[%c0, %c0_0] : memref<16x32xf32, #tpu.memory_space<vmem>>, vector<16x32xf32>
    %1 = arith.mulf %0, %0 : vector<16x32xf32>
    %cst = arith.constant dense<0.000000e+00> : vector<16xf32>
    %2 = vector.multi_reduction <add>, %1, %cst [1] : vector<16x32xf32> to vector<16xf32>
    %3 = vector.shape_cast %2 : vector<16xf32> to vector<16x1xf32>
    %cst_1 = arith.constant 3.200000e+01 : f32
    %4 = vector.broadcast %cst_1 : f32 to vector<16x1xf32>
    %5 = arith.divf %3, %4 : vector<16x1xf32>
    %cst_2 = arith.constant 9.99999997E-7 : f32
    %6 = vector.broadcast %cst_2 : f32 to vector<16x1xf32>
    %7 = arith.addf %5, %6 : vector<16x1xf32>
    %8 = math.rsqrt %7 : vector<16x1xf32>
    %c0_3 = arith.constant 0 : index
    %c0_4 = arith.constant 0 : index
    %9 = vector.load %arg2[%c0_3, %c0_4] : memref<1x32xf32, #tpu.memory_space<vmem>>, vector<1x32xf32>
    %10 = vector.broadcast %8 : vector<16x1xf32> to vector<16x32xf32>
    %11 = arith.mulf %0, %10 : vector<16x32xf32>
    %12 = vector.broadcast %9 : vector<1x32xf32> to vector<16x32xf32>
    %13 = arith.mulf %12, %11 : vector<16x32xf32>
    %c0_5 = arith.constant 0 : index
    %c0_6 = arith.constant 0 : index
    %14 = vector.load %arg3[%c0_5, %c0_6] : memref<16x32xf32, #tpu.memory_space<vmem>>, vector<16x32xf32>
    tpu.vector_store %arg3[%c0_5, %c0_6], %13 {strides = array<i32>} : memref<16x32xf32, #tpu.memory_space<vmem>>, vector<16x32xf32>,
    return
  }
  func.func @transform_0(%arg0: i32) -> (i32, i32) {
    %c0_i32 = arith.constant 0 : i32
    %c0_i32_0 = arith.constant 0 : i32
    return %arg0, %c0_i32 : i32, i32
  }
  func.func @transform_1(%arg0: i32) -> (i32, i32) {
    %c0_i32 = arith.constant 0 : i32
    %c0_i32_0 = arith.constant 0 : i32
    %c0_i32_1 = arith.constant 0 : i32
    return %c0_i32, %c0_i32_0 : i32, i32
  }
  func.func @transform_2(%arg0: i32) -> (i32, i32) {
    %c0_i32 = arith.constant 0 : i32
    %c0_i32_0 = arith.constant 0 : i32
    return %arg0, %c0_i32 : i32, i32
  }
}

</mosaic_0001>

<bundles_post_ra>
// kernel: tpu_custom_call.1
= control target key start
LH: loop header
LB: loop body
LE: loop exit
PB: predicated region body
PF: predicated region fallthrough
CT: control target
= control target key end

     0   :  { %7 = vsyncpa [#allocation3], 0  ;;  %s245_s0 = inlined_call_operand.hbm [shape: f32[16,32], index: 0, kind: input, shape index: {}]   ;;  %s246_s1 = inlined_call_operand.hbm [shape: f32[1,32], index: 1, kind: input, shape index: {}]   ;;  %s247_s2 = inlined_call_operand.hbm [shape: f32[16,32], index: 2, kind: output, shape index: {}]  }
   0x1   :  { %8 = vsyncpa [#allocation6], 0 }
   0x2   :  { %9 = vsyncpa [#allocation4], 0  ;;  %s14_s11 = sshll.u32 %s245_s0, 4  ;;  %s205_s12 = smov [#allocation2]   ;;  %s15_s11 = int_to_ptr.hbm [resolvable:$true] %s14_s11 }
   0x3   :  { %s16_s13 = sshll.u32 %s205_s12, 4  ;;  %s28_s16 = sshll.u32 %s246_s1, 4  ;;  %s17_s13 = int_to_ptr.vmem [resolvable:$true] %s16_s13  ;;  %s29_s16 = int_to_ptr.hbm [resolvable:$true] %s28_s16 }
   0x4   :  { %s206_s17 = smov 128   ;;  %s207_s18 = smov 8  }
   0x5   :  { %22 = dma.hbm_to_vmem [thread:$0]  %s15_s11, 256, %s17_s13, [#allocation3], %s206_s17, %s206_s17, %s207_s18  }
   0x6   :  { %s208_s19 = smov [#allocation5]  }
   0x7   :  { %s30_s20 = sshll.u32 %s208_s19, 4  ;;  %s31_s20 = int_to_ptr.vmem [resolvable:$true] %s30_s20 }
   0x8   :  { %33 = dma.hbm_to_vmem [thread:$0]  %s29_s16, 16, %s31_s20, [#allocation6]  }
   0x9   :  { %199 = dma.done.wait [#allocation3], 256  }
   0xa   :  { %200 = vsyncadd [#allocation3], 4294967040 }
   0xb   :  { %201 = dma.done.wait [#allocation6], 16  }
   0xc   :  { %202 = vsyncadd [#allocation6], 4294967280  ;;  %v42_v0 = vld [vmem:[#allocation2] sm:$0xff]  ;;  %vm46_vm0 = vcmask 261120   ;;  %v43_v2 = vld [vmem:[#allocation2 + $0x8] sm:$0xff]  ;;  %v209_v6 = vmov 32.0  }
   0xd   :  { %v44_v1 = vmul.f32 %v42_v0, %v42_v0  ;;  %v45_v4 = vmul.f32 %v43_v2, %v43_v2  ;;  %121 = vrcp.f32 %v209_v6  ;;  %v120_v27 = vld [vmem:[#allocation5] ss:$0 sm:$0xff]  ;;  %s210_s0 = smov [#allocation7]   ;;  %s100_s23 = sshll.u32 %s247_s2, 4  ;;  %s101_s23 = int_to_ptr.hbm [resolvable:$true] %s100_s23 }
   0xe   :  { %s98_s1 = sshll.u32 %s210_s0, 4  ;;  %s99_s1 = int_to_ptr.vmem [resolvable:$true] %s98_s1 }
   0xf   :  { %v47_v3 = vsel %vm46_vm0, %v44_v1, 0.0  ;;  %v50_v5 = vsel %vm46_vm0, %v45_v4, 0.0 }
  0x10   :  { %48 = vadd.xlane.f32.xlu0 %v47_v3 }
  0x13   :  { %v122_v7 = vpop.eup %121 }
  0x14   :  { %v54_v8 = vmul.f32 32.0, %v122_v7  ;;  %vm58_vm1 = vweird.f32 %v122_v7 }
  0x16   :  { %v55_v9 = vsub.f32 1.0, %v54_v8 }
  0x18   :  { %51 = vadd.xlane.f32.xlu0 %v50_v5  ;;  %v56_v10 = vmul.f32 %v122_v7, %v55_v9 }
  0x1a   :  { %v57_v11 = vadd.f32 %v122_v7, %v56_v10 }
  0x1c   :  { %v59_v12 = vsel %vm58_vm1, %v122_v7, %v57_v11 }
  0x83   :  { %v49_v13 = vpop.xlane.xlu0 %48 }
  0x84   :  { %v60_v14 = vmul.f32 %v59_v12, %v49_v13 }
  0x86   :  { %v62_v15 = vadd.f32 1e-06, %v60_v14 }
  0x88   :  { %123 = vrsqrt.f32 %v62_v15  ;;  %vm70_vm3 = vweird.f32 %v62_v15 }
  0x8b   :  { %v52_v16 = vpop.xlane.xlu0 %51 }
  0x8c   :  { %v61_v17 = vmul.f32 %v59_v12, %v52_v16 }
  0x8e   :  { %v124_v18 = vpop.eup %123  ;;  %v63_v19 = vadd.f32 1e-06, %v61_v17 }
  0x8f   :  { %v65_v20 = vmul.f32 %v124_v18, %v62_v15  ;;  %vm71_vm2 = vweird.f32 %v124_v18 }
  0x90   :  { %125 = vrsqrt.f32 %v63_v19  ;;  %vm72_vm4 = vmor %vm70_vm3, %vm71_vm2  ;;  %vm80_vm6 = vweird.f32 %v63_v19 }
  0x91   :  { %v66_v21 = vmul.f32 %v124_v18, %v65_v20 }
  0x93   :  { %v67_v22 = vmul.f32 0.5, %v66_v21 }
  0x95   :  { %v68_v23 = vsub.f32 1.5, %v67_v22 }
  0x96   :  { %v126_v24 = vpop.eup %125 }
  0x97   :  { %v69_v25 = vmul.f32 %v124_v18, %v68_v23  ;;  %v75_v26 = vmul.f32 %v126_v24, %v63_v19  ;;  %vm81_vm5 = vweird.f32 %v126_v24 }
  0x98   :  { %vm82_vm7 = vmor %vm80_vm6, %vm81_vm5 }
  0x99   :  { %v73_v28 = vsel %vm72_vm4, %v124_v18, %v69_v25  ;;  %v76_v29 = vmul.f32 %v126_v24, %v75_v26 }
  0x9a   :  { %v85_v30 = vmul.f32 %v73_v28, %v42_v0 }
  0x9b   :  { %v77_v31 = vmul.f32 0.5, %v76_v29 }
  0x9c   :  { %v90_v32 = vmul.f32 %v120_v27, %v85_v30 }
  0x9d   :  { %v78_v33 = vsub.f32 1.5, %v77_v31 }
  0x9e   :  { %92 = vst.msk [vmem:[#allocation7] sm:$0xff] %vm46_vm0, %v90_v32 }
  0x9f   :  { %v79_v34 = vmul.f32 %v126_v24, %v78_v33 }
  0xa1   :  { %v83_v35 = vsel %vm82_vm7, %v126_v24, %v79_v34 }
  0xa2   :  { %v86_v36 = vmul.f32 %v83_v35, %v43_v2 }
  0xa4   :  { %v91_v37 = vmul.f32 %v120_v27, %v86_v36 }
  0xa6   :  { %93 = vst.msk [vmem:[#allocation7 + $0x8] sm:$0xff] %vm46_vm0, %v91_v37 }
  0xa7   :  { %106 = dma.vmem_to_hbm [thread:$0]  %s99_s1, 256, %s101_s23, [#allocation4], %s206_s17, %s206_s17, %s207_s18  }
  0xa8   :  { %203 = dma.done.wait [#allocation4], 256  }
  0xa9   :  { %204 = vsyncadd [#allocation4], 4294967040 }
  0xaa   :  { %111 = vsyncpa [#allocation3], 1 }
  0xab   :  { %112 = vsyncpa [#allocation6], 1 }
  0xac   :  { %113 = vsyncpa [#allocation4], 1 }

</bundles_post_ra>
